<compile_context>
chip_gen: v7x
topology: tpu7x:2x2x1
jax: 0.10.0
libtpu: 0.0.40
codegen_flags: <defaults>
</compile_context>

<pallas_src>
import functools

import jax
import jax.numpy as jnp
from jax.experimental import pallas as pl
from jax.experimental.pallas import tpu as pltpu

_HI = jax.lax.Precision.HIGHEST


def _round_up(x, m):
    return ((x + m - 1) // m) * m


def _pick_t_tile(T):
    t8 = _round_up(max(int(T), 1), 8)
    tt = min(512, t8)
    Tp = _round_up(t8, tt)
    return tt, Tp


# ---------------------------------------------------------------------------
# Kernel 1: fused 4-way projection + G construction + sum over T (for mean).
# ---------------------------------------------------------------------------
def _proj_g_kernel(x_ref, w_ref, b_ref, g_ref, gsum_ref, *, rr, t_actual, tt,
                   needs_mask):
    t = pl.program_id(1)

    @pl.when(t == 0)
    def _():
        gsum_ref[...] = jnp.zeros_like(gsum_ref)

    # (tt, D) @ (D, 4*rr) on the MXU; K = D (full block, no K padding/grid).
    proj = jnp.dot(x_ref[0], w_ref[...], preferred_element_type=jnp.float32)
    proj = proj + b_ref[...].astype(jnp.float32)

    q1b = proj[:, 0 * rr:1 * rr]
    q2b = proj[:, 1 * rr:2 * rr]
    k1b = proj[:, 2 * rr:3 * rr]
    k2b = proj[:, 3 * rr:4 * rr]
    g = q1b * q2b * k1b * k2b                      # (tt, rr) == flattened G

    if needs_mask:  # zero padded T rows so the time-mean stays exact
        row = t * tt + jax.lax.broadcasted_iota(jnp.int32, (tt, rr), 0)
        g = jnp.where(row < t_actual, g, 0.0)

    g_ref[0] = g.astype(g_ref.dtype)
    gsum_ref[0] = gsum_ref[0] + jnp.sum(g, axis=0, keepdims=True)


def _fused_proj_g(x_p, w_exp, b_exp, *, rank, t_actual, tt):
    B, Tp, D = x_p.shape
    rr = rank * rank
    nw = w_exp.shape[1]                            # 4 * rr
    grid = (B, Tp // tt)
    kernel = functools.partial(_proj_g_kernel, rr=rr, t_actual=t_actual,
                               tt=tt, needs_mask=(Tp != t_actual))
    g, gsum = pl.pallas_call(
        kernel,
        out_shape=(jax.ShapeDtypeStruct((B, Tp, rr), x_p.dtype),
                   jax.ShapeDtypeStruct((B, 1, rr), jnp.float32)),
        grid_spec=pltpu.PrefetchScalarGridSpec(
            num_scalar_prefetch=0,
            grid=grid,
            in_specs=[
                pl.BlockSpec((1, tt, D), lambda b, t: (b, t, 0)),
                pl.BlockSpec((D, nw), lambda b, t: (0, 0)),
                pl.BlockSpec((1, nw), lambda b, t: (0, 0)),
            ],
            out_specs=(
                pl.BlockSpec((1, tt, rr), lambda b, t: (b, t, 0)),
                pl.BlockSpec((1, 1, rr), lambda b, t: (b, 0, 0)),  # resident acc
            ),
        ),
        compiler_params=pltpu.CompilerParams(
            dimension_semantics=("parallel", "arbitrary")),
    )(x_p, w_exp, b_exp)
    return g, gsum


# ---------------------------------------------------------------------------
# Kernel 2: lin_att with cross-modal product folded into a per-batch weight,
# bias / +beta / residual multiply fused into the store.
# ---------------------------------------------------------------------------
def _att_out_kernel(g_ref, w_ref, b_ref, x_ref, o_ref, *, beta):
    acc = jnp.dot(g_ref[0], w_ref[0], preferred_element_type=jnp.float32)
    acc = acc + b_ref[...].astype(jnp.float32) + beta
    o_ref[0] = (acc * x_ref[0].astype(jnp.float32)).astype(o_ref.dtype)


def _fused_att_out(g, w_comb, b_att2d, x_p, *, beta, tt):
    B, Tp, rr = g.shape
    D = w_comb.shape[-1]
    grid = (B, Tp // tt)
    return pl.pallas_call(
        functools.partial(_att_out_kernel, beta=float(beta)),
        out_shape=jax.ShapeDtypeStruct((B, Tp, D), x_p.dtype),
        grid_spec=pltpu.PrefetchScalarGridSpec(
            num_scalar_prefetch=0,
            grid=grid,
            in_specs=[
                pl.BlockSpec((1, tt, rr), lambda b, t: (b, t, 0)),
                pl.BlockSpec((1, rr, D), lambda b, t: (b, 0, 0)),
                pl.BlockSpec((1, D), lambda b, t: (0, 0)),
                pl.BlockSpec((1, tt, D), lambda b, t: (b, t, 0)),
            ],
            out_specs=pl.BlockSpec((1, tt, D), lambda b, t: (b, t, 0)),
        ),
        compiler_params=pltpu.CompilerParams(
            dimension_semantics=("parallel", "parallel")),
    )(g, w_comb, b_att2d, x_p)


# ---------------------------------------------------------------------------
# Module mirrors
# ---------------------------------------------------------------------------
class PallasMMAttention:
    def __init__(self, input_dim, rank, n_modals, beta, *, key):
        self.input_dim = list(input_dim)
        self.rank = rank
        self.n_modals = n_modals
        self.beta = float(beta)
        R = rank
        rr = R * R

        # Kronecker-expansion matrices folded into the projection weights:
        #   (q @ E1)[:, c] = q[:, c // R]     (q @ E2)[:, c] = q[:, c % R]
        E1 = jnp.kron(jnp.eye(R, dtype=jnp.float32),
                      jnp.ones((1, R), jnp.float32))         # (R, R*R)
        E2 = jnp.tile(jnp.eye(R, dtype=jnp.float32), (1, R))  # (R, R*R)

        def xavier(k, fan_in, fan_out):
            limit = (6.0 / (fan_in + fan_out)) ** 0.5
            return jax.random.uniform(k, (fan_in, fan_out), jnp.float32,
                                      -limit, limit)

        keys = iter(jax.random.split(key, 5 * n_modals))
        self.w_q1, self.w_q2, self.w_k1, self.w_k2 = [], [], [], []
        self.b_q1, self.b_q2, self.b_k1, self.b_k2 = [], [], [], []
        self.w_att, self.b_att = [], []
        self.w_exp, self.b_exp = [], []
        for j in range(n_modals):
            D = self.input_dim[j]
            wq1 = xavier(next(keys), D, R)
            wq2 = xavier(next(keys), D, R)
            wk1 = xavier(next(keys), D, R)
            wk2 = xavier(next(keys), D, R)
            watt = xavier(next(keys), rr, D)
            bq1 = jnp.zeros((R,), jnp.float32)
            bq2 = jnp.zeros((R,), jnp.float32)
            bk1 = jnp.zeros((R,), jnp.float32)
            bk2 = jnp.zeros((R,), jnp.float32)
            batt = jnp.zeros((D,), jnp.float32)

            self.w_q1.append(wq1); self.w_q2.append(wq2)
            self.w_k1.append(wk1); self.w_k2.append(wk2)
            self.b_q1.append(bq1); self.b_q2.append(bq2)
            self.b_k1.append(bk1); self.b_k2.append(bk2)
            self.w_att.append(watt); self.b_att.append(batt)

            # One-time weight fusion: single (D, 4*R^2) projection weight.
            w_exp = jnp.concatenate(
                [wq1 @ E1, wq2 @ E2, wk1 @ E1, wk2 @ E2], axis=1)
            b_exp = jnp.concatenate(
                [bq1 @ E1, bq2 @ E2, bk1 @ E1, bk2 @ E2]).reshape(1, 4 * rr)
            self.w_exp.append(w_exp)
            self.b_exp.append(b_exp)

    def __call__(self, x):
        R = self.rank
        rr = R * R
        B, T = x[0].shape[0], x[0].shape[1]
        tt, Tp = _pick_t_tile(T)

        x_p, G_flat, M_qk = [], [], []
        for j in range(self.n_modals):
            xj = x[j]
            if Tp != T:  # pad T once per modal; reused by both kernels
                xj = jnp.pad(xj, ((0, 0), (0, Tp - T), (0, 0)))
            x_p.append(xj)
            g, gsum = _fused_proj_g(xj, self.w_exp[j], self.b_exp[j],
                                    rank=R, t_actual=T, tt=tt)
            G_flat.append(g)
            M_qk.append((gsum[:, 0, :] / float(T)).reshape(B, R, R))

        att = []
        for j in range(self.n_modals):
            C = None
            for l in range(self.n_modals):
                if l == j:
                    continue
                C = M_qk[l] if C is None else jnp.matmul(C, M_qk[l],
                                                         precision=_HI)
            if C is None:  # single-modal degenerate case
                C = jnp.broadcast_to(jnp.eye(R, dtype=jnp.float32), (B, R, R))
            # Fold the cross-modal product into a per-batch lin_att weight:
            #   vec(G @ C) @ W_att  ==  G_flat @ (kron(I_R, C) @ W_att)
            watt_r = self.w_att[j].reshape(R, R, self.input_dim[j])
            w_comb = jnp.einsum('bkr,ard->bakd', C, watt_r,
                                precision=_HI).reshape(B, rr,
                                                       self.input_dim[j])
            out = _fused_att_out(G_flat[j], w_comb,
                                 self.b_att[j].reshape(1, -1), x_p[j],
                                 beta=self.beta, tt=tt)
            att.append(out[:, :T, :] if Tp != T else out)
        return att


class PallasMMTLayer:
    def __init__(self, input_dim, rank, n_modals, beta, droprate=0.1, *, key):
        self.input_dim = input_dim
        self.n_modals = n_modals
        self.droprate = droprate
        self.attention = PallasMMAttention(input_dim, rank, n_modals, beta,
                                           key=key)

    def __call__(self, x):
        aware = self.attention(x)
        # TODO(synk): training-mode nn.Dropout not implemented; inference (eval) semantics = identity.
        return aware


# ---------------------------------------------------------------------------
# Test
# ---------------------------------------------------------------------------
if __name__ == "__main__":
    key = jax.random.PRNGKey(0)
    pk, xk1, xk2 = jax.random.split(key, 3)

    batch, seq = 2, 8
    input_dim = [32, 48]
    rank, n_modals, beta = 8, 2, 0.5

    x = [
        jax.random.normal(xk1, (batch, seq, input_dim[0]), jnp.float32),
        jax.random.normal(xk2, (batch, seq, input_dim[1]), jnp.float32),
    ]

    layer = PallasMMTLayer(input_dim, rank, n_modals, beta, droprate=0.1,
                           key=pk)
    out = layer(x)
    out = [jax.block_until_ready(o) for o in out]

    # ---- pure-JAX reference (same weights, eval-mode dropout) ----
    def ref_linear(x_, w, b):
        return jnp.dot(x_, w, precision=_HI) + b

    att_m = layer.attention
    G_qk, M_qk, ref = [], [], []
    for j in range(n_modals):
        q1 = ref_linear(x[j], att_m.w_q1[j], att_m.b_q1[j])
        q2 = ref_linear(x[j], att_m.w_q2[j], att_m.b_q2[j])
        k1 = ref_linear(x[j], att_m.w_k1[j], att_m.b_k1[j])
        k2 = ref_linear(x[j], att_m.w_k2[j], att_m.b_k2[j])
        G = (q1[..., :, None] * q2[..., None, :]) * \
            (k1[..., :, None] * k2[..., None, :])
        G_qk.append(G)
        M_qk.append(jnp.mean(G, axis=1))
    for j in range(n_modals):
        a = G_qk[j]
        for l in range(n_modals):
            if l == j:
                continue
            a = jnp.einsum('ijkl,ilo->ijko', a, M_qk[l], precision=_HI)
        B, T, R1, R2 = a.shape
        a = a.reshape(B, T, R1 * R2)
        a = ref_linear(a, att_m.w_att[j], att_m.b_att[j])
        ref.append(a * x[j] + beta * x[j])

    for j in range(n_modals):
        assert out[j].shape == (batch, seq, input_dim[j])
        assert jnp.allclose(out[j], ref[j], atol=3e-2, rtol=3e-3), \
            f"modal {j} mismatch"

    print("KERNEL_OK")
</pallas_src>

<mosaic_0001>
module attributes {stable_mosaic.version = 11 : i64} {
  func.func @_proj_g_kernel(%arg0: i32, %arg1: i32, %arg2: memref<1x8x32xf32, #tpu.memory_space<vmem>>, %arg3: memref<32x256xf32, #tpu.memory_space<vmem>>, %arg4: memref<1x256xf32, #tpu.memory_space<vmem>>, %arg5: memref<1x8x64xf32, #tpu.memory_space<vmem>>, %arg6: memref<1x1x64xf32, #tpu.memory_space<vmem>>) attributes {dimension_semantics = [#tpu.dimension_semantics<parallel>, #tpu.dimension_semantics<arbitrary>], iteration_bounds = array<i64: 2, 1>, scalar_prefetch = 0 : i64, scratch_operands = 0 : i64, tpu.core_type = #tpu.core_type<tc>, window_params = [{transform_indices = @transform_0, window_bounds = array<i64: 1, 8, 32>}, {pipeline_mode = #tpu.pipeline_mode<synchronous>, transform_indices = @transform_1, window_bounds = array<i64: 32, 256>}, {pipeline_mode = #tpu.pipeline_mode<synchronous>, transform_indices = @transform_2, window_bounds = array<i64: 1, 256>}, {transform_indices = @transform_3, window_bounds = array<i64: 1, 8, 64>}, {transform_indices = @transform_4, window_bounds = array<i64: 1, 1, 64>}]} {
    %c0_i32 = arith.constant 0 : i32
    %0 = arith.cmpi eq, %arg1, %c0_i32 : i32
    %1 = arith.extui %0 : i1 to i32
    %c0_i32_0 = arith.constant 0 : i32
    %2 = arith.cmpi ne, %1, %c0_i32_0 : i32
    scf.if %2 {
      %cst_17 = arith.constant 0.000000e+00 : f32
      %28 = vector.broadcast %cst_17 : f32 to vector<1x1x64xf32>
      %c0_18 = arith.constant 0 : index
      %c0_19 = arith.constant 0 : index
      %c0_20 = arith.constant 0 : index
      %29 = vector.load %arg6[%c0_18, %c0_19, %c0_20] : memref<1x1x64xf32, #tpu.memory_space<vmem>>, vector<1x1x64xf32>
      tpu.vector_store %arg6[%c0_18, %c0_19, %c0_20], %28 {strides = array<i32>} : memref<1x1x64xf32, #tpu.memory_space<vmem>>, vector<1x1x64xf32>,
    } else {
    }
    %c0 = arith.constant 0 : index
    %c0_1 = arith.constant 0 : index
    %c0_2 = arith.constant 0 : index
    %3 = vector.load %arg2[%c0, %c0_1, %c0_2] : memref<1x8x32xf32, #tpu.memory_space<vmem>>, vector<1x8x32xf32>
    %4 = vector.shape_cast %3 : vector<1x8x32xf32> to vector<8x32xf32>
    %c0_3 = arith.constant 0 : index
    %c0_4 = arith.constant 0 : index
    %5 = vector.load %arg3[%c0_3, %c0_4] : memref<32x256xf32, #tpu.memory_space<vmem>>, vector<32x256xf32>
    %cst = arith.constant dense<0.000000e+00> : vector<8x256xf32>
    %6 = tpu.matmul %4, %5, %cst {dimension_numbers = #tpu.dot_dimension_numbers<[1], [0], [0], [1], [0, 0, 1, 1], [], []>} : vector<8x32xf32>, vector<32x256xf32>, vector<8x256xf32> -> vector<8x256xf32>
    %c0_5 = arith.constant 0 : index
    %c0_6 = arith.constant 0 : index
    %7 = vector.load %arg4[%c0_5, %c0_6] : memref<1x256xf32, #tpu.memory_space<vmem>>, vector<1x256xf32>
    %8 = vector.broadcast %7 : vector<1x256xf32> to vector<8x256xf32>
    %9 = arith.addf %6, %8 : vector<8x256xf32>
    %10 = vector.extract_strided_slice %9 {offsets = [0, 0], sizes = [8, 64], strides = [1, 1]} : vector<8x256xf32> to vector<8x64xf32>
    %11 = vector.extract_strided_slice %9 {offsets = [0, 64], sizes = [8, 64], strides = [1, 1]} : vector<8x256xf32> to vector<8x64xf32>
    %12 = vector.extract_strided_slice %9 {offsets = [0, 128], sizes = [8, 64], strides = [1, 1]} : vector<8x256xf32> to vector<8x64xf32>
    %13 = vector.extract_strided_slice %9 {offsets = [0, 192], sizes = [8, 64], strides = [1, 1]} : vector<8x256xf32> to vector<8x64xf32>
    %14 = arith.mulf %10, %11 : vector<8x64xf32>
    %15 = arith.mulf %14, %12 : vector<8x64xf32>
    %16 = arith.mulf %15, %13 : vector<8x64xf32>
    %c0_7 = arith.constant 0 : index
    %c0_8 = arith.constant 0 : index
    %c0_9 = arith.constant 0 : index
    %17 = vector.load %arg5[%c0_7, %c0_8, %c0_9] : memref<1x8x64xf32, #tpu.memory_space<vmem>>, vector<1x8x64xf32>
    %18 = vector.shape_cast %17 : vector<1x8x64xf32> to vector<8x64xf32>
    %19 = vector.shape_cast %16 : vector<8x64xf32> to vector<1x8x64xf32>
    tpu.vector_store %arg5[%c0_7, %c0_8, %c0_9], %19 {strides = array<i32>} : memref<1x8x64xf32, #tpu.memory_space<vmem>>, vector<1x8x64xf32>,
    %c0_10 = arith.constant 0 : index
    %c0_11 = arith.constant 0 : index
    %c0_12 = arith.constant 0 : index
    %20 = vector.load %arg6[%c0_10, %c0_11, %c0_12] : memref<1x1x64xf32, #tpu.memory_space<vmem>>, vector<1x1x64xf32>
    %21 = vector.shape_cast %20 : vector<1x1x64xf32> to vector<1x64xf32>
    %cst_13 = arith.constant dense<0.000000e+00> : vector<64xf32>
    %22 = vector.multi_reduction <add>, %16, %cst_13 [0] : vector<8x64xf32> to vector<64xf32>
    %23 = vector.shape_cast %22 : vector<64xf32> to vector<1x64xf32>
    %24 = arith.addf %21, %23 : vector<1x64xf32>
    %c0_14 = arith.constant 0 : index
    %c0_15 = arith.constant 0 : index
    %c0_16 = arith.constant 0 : index
    %25 = vector.load %arg6[%c0_14, %c0_15, %c0_16] : memref<1x1x64xf32, #tpu.memory_space<vmem>>, vector<1x1x64xf32>
    %26 = vector.shape_cast %25 : vector<1x1x64xf32> to vector<1x64xf32>
    %27 = vector.shape_cast %24 : vector<1x64xf32> to vector<1x1x64xf32>
    tpu.vector_store %arg6[%c0_14, %c0_15, %c0_16], %27 {strides = array<i32>} : memref<1x1x64xf32, #tpu.memory_space<vmem>>, vector<1x1x64xf32>,
    return
  }
  func.func @transform_0(%arg0: i32, %arg1: i32) -> (i32, i32, i32) {
    %c0_i32 = arith.constant 0 : i32
    %c0_i32_0 = arith.constant 0 : i32
    return %arg0, %arg1, %c0_i32 : i32, i32, i32
  }
  func.func @transform_1(%arg0: i32, %arg1: i32) -> (i32, i32) {
    %c0_i32 = arith.constant 0 : i32
    %c0_i32_0 = arith.constant 0 : i32
    %c0_i32_1 = arith.constant 0 : i32
    return %c0_i32, %c0_i32_0 : i32, i32
  }
  func.func @transform_2(%arg0: i32, %arg1: i32) -> (i32, i32) {
    %c0_i32 = arith.constant 0 : i32
    %c0_i32_0 = arith.constant 0 : i32
    %c0_i32_1 = arith.constant 0 : i32
    return %c0_i32, %c0_i32_0 : i32, i32
  }
  func.func @transform_3(%arg0: i32, %arg1: i32) -> (i32, i32, i32) {
    %c0_i32 = arith.constant 0 : i32
    %c0_i32_0 = arith.constant 0 : i32
    return %arg0, %arg1, %c0_i32 : i32, i32, i32
  }
  func.func @transform_4(%arg0: i32, %arg1: i32) -> (i32, i32, i32) {
    %c0_i32 = arith.constant 0 : i32
    %c0_i32_0 = arith.constant 0 : i32
    %c0_i32_1 = arith.constant 0 : i32
    return %arg0, %c0_i32, %c0_i32_0 : i32, i32, i32
  }
}

</mosaic_0001>

<bundles_post_ra>
// kernel: tpu_custom_call.1
= control target key start
LH: loop header
LB: loop body
LE: loop exit
PB: predicated region body
PF: predicated region fallthrough
CT: control target
= control target key end

     0   :  { %10 = vsyncpa [#allocation3], 0  ;;  %s1109_s0 = inlined_call_operand.hbm [shape: f32[2,8,32], index: 0, kind: input, shape index: {}]   ;;  %s1110_s1 = inlined_call_operand.hbm [shape: f32[32,256], index: 1, kind: input, shape index: {}]   ;;  %s1111_s2 = inlined_call_operand.vmem [shape: f32[1,256], index: 2, kind: input, shape index: {}]   ;;  %s1112_s3 = inlined_call_operand.hbm [shape: f32[2,8,64], index: 3, kind: output, shape index: {0}]   ;;  %s1113_s4 = inlined_call_operand.hbm [shape: f32[2,1,64], index: 4, kind: output, shape index: {1}]  }
   0x1   :  { %12 = vsyncpa [#allocation3 + $0x1], 0 }
   0x2   :  { %13 = vsyncpa [#allocation6], 0 }
   0x3   :  { %14 = vsyncpa [#allocation4], 0 }
   0x4   :  { %16 = vsyncpa [#allocation4 + $0x1], 0 }
   0x5   :  { %17 = vsyncpa [#allocation9], 0 }
   0x6   :  { %19 = vsyncpa [#allocation9 + $0x1], 0  ;;  %s849_s15 = smov 0   ;;  %s851_s16 = smov 0  }
   0x7   :  { %s853_s17 = smov 0   ;;  %s855_s18 = smov 0  }
   0x8   :  { %s857_s19 = smov 0   ;;  %s859_s20 = smov 0  }
   0x9 LB: > { %s531_s21 = sadd.s32 4294967295, %s814_s20   ;;  %s532_s22 = sadd.s32 4294967294, %s814_s20   ;;  %s814_s20 = sphi %s859_s20, %s25_s20   ;;  %s810_s19 = sphi %s857_s19, %s1137_s19   ;;  %s806_s18 = sphi %s855_s18, %s1136_s18   ;;  %s802_s17 = sphi %s853_s17, %s1135_s17   ;;  %s798_s16 = sphi %s851_s16, %s1134_s16   ;;  %s794_s15 = sphi %s849_s15, %s1133_s15  }
   0xa   : > { %p59_p0 = scmp.ne.s32.totalorder %s798_s16, %s794_s15  ;;  %p883_p1 = scmp.eq.s32.totalorder %s531_s21, 0 }
   0xb   : > { %p887_p2 = scmp.eq.s32.totalorder %s531_s21, 1  ;;  %p133_p3 = scmp.eq.s32.totalorder %s532_s22, 1 }
   0xc   : > { %s1118_s23 = scalar_select %p883_p1, 1, 0 }
   0xd   : > { %s1119_s24 = scalar_select %p887_p2, 1, 0 }
   0xe   : > { %p893_p4 = por %p883_p1, %p59_p0  ;;  %p533_p5 = scmp.ge.s32.totalorder %s814_s20, 1 }
   0xf   : > { %p898_p6 = por %p133_p3, %p59_p0  ;;  %p166_p7 = scmp.lt.s32.totalorder %s814_s20, 3 }
  0x10   : > { %s1120_s25 = scalar_select %p893_p4, 1, 0 }
  0x11   : > { %s1121_s26 = scalar_select %p898_p6, 1, 0 }
  0x12   : > { %p903_p8 = pnand %p533_p5, %p166_p7  ;;  %s816_s28 = smov [#allocation5]  }
  0x13   : > { %s178_s29 = sshll.u32 %s816_s28, 4  ;;  %s37_s5 = sadd.s32 1, %s810_s19  ;;  %s179_s29 = int_to_ptr.vmem [resolvable:$true] %s178_s29 }
  0x14   : > { %s1122_s27 = scalar_select %p903_p8, 1, 0 }
  0x15   : > { %p566_p9 = pneg %p903_p8  ;;  %s638_s8 = scalar_lea.hbm %s1110_s1, 1024 }
  0x16   : > { %p639_p12 = scmp.ne.s32.totalorder %s1110_s1, %s638_s8  ;;  %p645_p5 = scmp.lt.u32.totalorder %s638_s8, %s1110_s1 }
  0x17   : > { %p912_p11 = pnand %p566_p9, %p883_p1 }
  0x19   : > { %p640_p13 = pneg %p912_p11 }
  0x1b   : > { %p641_p0 = pnand %p640_p13, %p639_p12 }
  0x1d   : > { %p642_p3 = pneg %p641_p0 }
  0x1f   : > { %p647_p7 = pnand %p645_p5, %p642_p3 }
  0x21   : > { %650 = shalt.err (!%p647_p7)
}
  0x22   : > { %s651_s13 = scalar_lea.vmem %s179_s29, 1024  ;;  %p659_p1 = scmp.lt.s32.totalorder %s179_s29, %s179_s29 }
  0x23   : > { %p652_p9 = scmp.ne.s32.totalorder %s179_s29, %s651_s13  ;;  %p660_p4 = scmp.lt.s32.totalorder %s651_s13, %s651_s13 }
  0x25   : > { %p654_p10 = pnand %p652_p9, %p640_p13  ;;  %p661_p8 = por %p660_p4, %p659_p1 }
  0x27   : > { %p655_p6 = pneg %p654_p10 }
  0x29   : > { %p662_p2 = pnand %p661_p8, %p655_p6 }
  0x2b   : > { %665 = shalt.err (!%p662_p2)
}
  0x2c   : > { %s817_s14 = smov 256   ;;  %s818_s21 = smov 16  }
  0x2d   : > { %569 = dma.hbm_to_vmem [thread:$0]  (!%p912_p11), %s1110_s1, 1024, %s179_s29, [#allocation6], %s817_s14, %s817_s14, %s818_s21  }
  0x2e   : > { %p39_p1 = scmp.ge.s32.totalorder %s37_s5, 2  ;;  %s46_s6 = sadd.s32 1, %s802_s17 }
  0x2f   : > { %p53_p2 = scmp.ne.s32.totalorder %s802_s17, %s798_s16  ;;  %p54_p4 = scmp.eq.s32.totalorder %s814_s20, 0 }
  0x30   : > { %s1139_s5 = smov (%p39_p1, %s37_s5), 0  ;;  %p1125_p8 = scmp.ne.s32.totalorder %s1119_s24, 0 }
  0x31   : > { %p939_p6 = por %p54_p4, %p53_p2  ;;  %s41_s30 = ssub.s32 %s810_s19, %s1139_s5 }
  0x32   : > { %p945_p10 = por %p1125_p8, %p53_p2  ;;  %p582_p12 = scmp.lt.s32.totalorder %s814_s20, 2 }
  0x33   : > { %p44_p11 = scmp.eq.s32.totalorder %s41_s30, 0  ;;  %s195_s29 = sand.u32 1, %s802_s17  }
  0x34   : > { %s536_s9 = sshll.u32 %s195_s29, 3  ;;  %s537_s11 = sshll.u32 %s810_s19, 7 }
  0x35   : > { %s954_s10 = scalar_select %p44_p11, %s802_s17, %s46_s6  }
  0x36   : > { %s960_s14 = scalar_lea.hbm %s1109_s0, %s537_s11  ;;  %s199_s24 = scalar_lea.vmem [#allocation2], %s536_s9 }
  0x37   : > { %s207_s21 = sshll.u32 %s199_s24, 4  ;;  %p966_p13 = pnand %p582_p12, %p939_p6  ;;  %s962_s21 = int_to_ptr.vmem [resolvable:$true] %s207_s21 }
  0x38   : > { %s196_s28 = scalar_lea.sflag [#allocation3], %s195_s29  ;;  %s666_s6 = scalar_lea.hbm %s960_s14, 128 }
  0x39   : > { %p667_p0 = scmp.ne.s32.totalorder %s960_s14, %s666_s6  ;;  %p668_p3 = pneg %p966_p13 }
  0x3a   : > { %s671_s11 = scalar_lea.hbm %s1109_s0, 256  ;;  %p672_p9 = scmp.lt.u32.totalorder %s960_s14, %s1109_s0 }
  0x3b   : > { %p669_p5 = pnand %p668_p3, %p667_p0  ;;  %p673_p1 = scmp.lt.u32.totalorder %s671_s11, %s666_s6 }
  0x3c   : > { %p675_p4 = scmp.lt.u32.totalorder %s666_s6, %s960_s14 }
  0x3d   : > { %p670_p7 = pneg %p669_p5  ;;  %p674_p2 = por %p673_p1, %p672_p9 }
  0x3f   : > { %p676_p6 = por %p675_p4, %p674_p2 }
  0x41   : > { %p677_p8 = pnand %p676_p6, %p670_p7 }
  0x43   : > { %680 = shalt.err (!%p677_p8)
}
  0x44   : > { %s681_s29 = scalar_lea.vmem %s962_s21, 128  ;;  %s819_s13 = smov [#allocation2]  }
  0x45   : > { %p682_p12 = scmp.ne.s32.totalorder %s962_s21, %s681_s29  ;;  %s686_s24 = sshll.u32 %s819_s13, 4  ;;  %s687_s24 = int_to_ptr.vmem [resolvable:$false] %s686_s24 }
  0x46   : > { %s688_s30 = scalar_lea.vmem %s687_s24, 256  ;;  %p689_p5 = scmp.lt.s32.totalorder %s962_s21, %s687_s24 }
  0x47   : > { %p684_p11 = pnand %p682_p12, %p668_p3  ;;  %p690_p9 = scmp.lt.s32.totalorder %s688_s30, %s681_s29 }
  0x49   : > { %p685_p0 = pneg %p684_p11  ;;  %p691_p1 = por %p690_p9, %p689_p5 }
  0x4b   : > { %p692_p2 = pnand %p691_p1, %p685_p0 }
  0x4d   : > { %695 = shalt.err (!%p692_p2)
}
  0x4e   : > { %573 = dma.hbm_to_vmem [thread:$0]  (!%p966_p13), %s960_s14, 128, %s962_s21, %s196_s28  }
  0x4f   : > { %p1128_p7 = scmp.ne.s32.totalorder %s1122_s27, 0 }
  0x50   : > { %s998_s6 = sand.u32 (!%p1128_p7), 1, %s798_s16   ;;  %p1129_p3 = scmp.ne.s32.totalorder (!%p1128_p7), %s1120_s25, 0 }
  0x51   : > { %216 = sbr.rel (%p1128_p7) target bundleno = 479 (0x1df), region = 32  ;;  %s539_s9 = sshll.u32 (!%p1128_p7), %s998_s6, 3 }
  0x52   : > { %s219_s11 = scalar_lea.sflag (!%p1128_p7), [#allocation3], %s998_s6  ;;  %s222_s7 = scalar_lea.vmem (!%p1128_p7), [#allocation2], %s539_s9 }
  0x58   : > { %777 = dma.done.wait (%p1129_p3), %s219_s11, 128  }
  0x59   : > { %779 = vsyncadd (%p1129_p3), %s219_s11, 4294967168  ;;  %p1130_p13 = scmp.ne.s32.totalorder %s1118_s23, 0 }
  0x5b   : > { %781 = dma.done.wait (%p1130_p13), [#allocation6], 1024  }
  0x5c   : > { %783 = vsyncadd (%p1130_p13), [#allocation6], 4294966272  ;;  %vm259_vm0 = vcmask 516096   ;;  %s1013_s27 = scalar_lea.vmem [#allocation8], %s998_s6  ;;  %v820_v0 = vmov 0.0   ;;  %v263_v1 = vld [vmem:[#allocation5 + $0x8] sm:$0xff]  ;;  %v272_v14 = vlaneseq }
  0x5d   : > { %260 = vst.msk [vmem:[%s1013_s27] sm:$0x1] %vm259_vm0, %v820_v0  ;;  %350 = vmatprep.mubr.f32.mxu0 %v820_v0  ;;  %v265_v2 = vld [vmem:[#allocation5 + $0x18] sm:$0xff]  ;;  %v262_v3 = vld [vmem:[#allocation5] sm:$0xff]  ;;  %v264_v5 = vld [vmem:[#allocation5 + $0x10] sm:$0xff]  ;;  %vm282_vm1 = vcmask 261120  }
  0x5e   : > { %v548_v4 = vpack.c.bf16 %v265_v2, %v263_v1  ;;  %v267_v6 = vld [vmem:[#allocation5 + $0x28] sm:$0xff]  ;;  %v269_v7 = vld [vmem:[#allocation5 + $0x38] sm:$0xff]  ;;  %v550_v8 = vpack.c.bf16 %v264_v5, %v262_v3  ;;  %v266_v10 = vld [vmem:[#allocation5 + $0x20] sm:$0xff]  ;;  %v273_v15 = vshrl.u32 %v272_v14, 7  ;;  %s821_s14 = smov 64   ;;  %s544_s21 = sshll.u32 %s806_s18, 7 }
  0x5f   : > { %v552_v9 = vpack.c.bf16 %v269_v7, %v267_v6  ;;  %v268_v11 = vld [vmem:[#allocation5 + $0x30] sm:$0xff]  ;;  %s248_s22 = scalar_lea.vmem [#allocation7], %s539_s9  ;;  %vm368_vm2 = vcmask 523264   ;;  %s1026_s13 = scalar_lea.hbm %s1112_s3, %s544_s21 }
  0x60   : > { %549 = vmatprep.subr.bf16.mxu0 %v548_v4  ;;  %v554_v12 = vpack.c.bf16 %v268_v11, %v266_v10  ;;  %v261_v13 = vld [vmem:[%s222_s7] sm:$0xff]  ;;  %v274_v16 = vsub.s32 0, %v273_v15  ;;  %v278_v19 = vsub.s32 1, %v273_v15  ;;  %s400_s28 = sshll.u32 %s248_s22, 4  ;;  %s382_s24 = scalar_lea.sflag [#allocation4], %s998_s6  ;;  %s1028_s28 = int_to_ptr.vmem [resolvable:$true] %s400_s28 }
  0x61   : > { %551 = vmatpush1.bf16.msra.mxu0 %v550_v8  ;;  %v270_v17 = vld [vmem:[%s1111_s2] sm:$0x3]  ;;  %s696_s30 = scalar_lea.vmem %s1028_s28, 128  ;;  %s822_s9 = smov [#allocation7]  }
  0x62   : > { %553 = vmatprep.subr.bf16.mxu0 %v552_v9  ;;  %v275_v18 = vrot.slane %v270_v17, %v274_v16  ;;  %v279_v22 = vrot.slane %v270_v17, %v278_v19  ;;  %p697_p4 = scmp.ne.s32.totalorder %s1028_s28, %s696_s30  ;;  %s700_s11 = sshll.u32 %s822_s9, 4  ;;  %s701_s11 = int_to_ptr.vmem [resolvable:$false] %s700_s11 }
  0x63   : > { %s702_s7 = scalar_lea.vmem %s701_s11, 256  ;;  %p703_p12 = scmp.lt.s32.totalorder %s1028_s28, %s701_s11 }
  0x64   : > { %p698_p6 = pnand %p697_p4, %p945_p10  ;;  %p704_p11 = scmp.lt.s32.totalorder %s702_s7, %s696_s30 }
  0x65   : > { %555 = vmatpush1.bf16.msra.mxu0 %v554_v12 }
  0x66   : > { %p699_p8 = pneg %p698_p6  ;;  %p705_p0 = por %p704_p11, %p703_p12 }
  0x68   : > { %542 = vmatmul.mubr.msk.f32.vlgmr.msra.gmra.mrb[0].mxu0 %vm282_vm1, %v261_v13  ;;  %p706_p5 = pnand %p705_p0, %p699_p8 }
 0x13b   : > { %v352_v20 = vpop.f32.mrb[0].mxu0 }
 0x13c   : > { %v353_v21 = vadd.f32 %v352_v20, %v275_v18  ;;  %v354_v23 = vpop.f32.mrb[1].mxu0 }
 0x13d   : > { %v355_v24 = vadd.f32 %v354_v23, %v279_v22 }
 0x13e   : > { %358 = vrot.lane.b32.xlu0 %v353_v21, %s821_s14 }
 0x142   : > { %364 = vrot.lane.b32.xlu0 %v355_v24, %s821_s14 }
 0x1b0   : > { %v359_v25 = vpop.permute.xlu0 %358 }
 0x1b1   : > { %v361_v26 = vmul.f32 %v359_v25, %v353_v21 }
 0x1b3   : > { %v362_v27 = vmul.f32 %v361_v26, %v355_v24 }
 0x1b4   : > { %v365_v28 = vpop.permute.xlu0 %364 }
 0x1b5   : > { %v367_v29 = vmul.f32 %v365_v28, %v362_v27 }
 0x1b7   : > { %v371_v30 = vsel %vm368_vm2, %v367_v29, 0.0  ;;  %369 = vst.msk [vmem:[%s248_s22] sm:$0xff] %vm368_vm2, %v367_v29 }
 0x1b8   : > { %v372_v31 = vrot.slane %v371_v30, 4 }
 0x1b9   : > { %709 = shalt.err (!%p706_p5)
}
 0x1ba   : > { %s710_s23 = scalar_lea.hbm %s1026_s13, 128  ;;  %s714_s21 = scalar_lea.hbm %s1112_s3, 256 }
 0x1bb   : > { %p711_p9 = scmp.ne.s32.totalorder %s1026_s13, %s710_s23  ;;  %p715_p7 = scmp.lt.u32.totalorder %s1026_s13, %s1112_s3 }
 0x1bc   : > { %p716_p3 = scmp.lt.u32.totalorder %s714_s21, %s710_s23  ;;  %p718_p4 = scmp.lt.u32.totalorder %s710_s23, %s1026_s13 }
 0x1bd   : > { %p712_p1 = pnand %p711_p9, %p945_p10 }
 0x1be   : > { %p717_p13 = por %p716_p3, %p715_p7 }
 0x1bf   : > { %p713_p2 = pneg %p712_p1 }
 0x1c0   : > { %p719_p6 = por %p718_p4, %p717_p13 }
 0x1c2   : > { %p720_p8 = pnand %p719_p6, %p713_p2 }
 0x1c4   : > { %723 = shalt.err (!%p720_p8)
}
 0x1c5   : > { %562 = dma.vmem_to_hbm [thread:$0]  (%p945_p10), %s1028_s28, 128, %s1026_s13, %s382_s24   ;;  %v373_v32 = vadd.f32 %v372_v31, %v371_v30  ;;  %v370_v36 = vld [vmem:[%s1013_s27] sm:$0x1] }
 0x1c6   : > { %s545_s29 = sshll.u32 %s806_s18, 4  ;;  %s413_s30 = sshll.u32 %s1013_s27, 4  ;;  %s1060_s30 = int_to_ptr.vmem [resolvable:$true] %s413_s30 }
 0x1c7   : > { %v374_v33 = vrot.slane %v373_v32, 2  ;;  %s1058_s7 = scalar_lea.hbm %s1113_s4, %s545_s29  ;;  %s387_s28 = scalar_lea.sflag [#allocation9], %s998_s6 }
 0x1c8   : > { %s724_s13 = scalar_lea.vmem %s1060_s30, 16  ;;  %s823_s18 = smov [#allocation8]  }
 0x1c9   : > { %v375_v34 = vadd.f32 %v374_v33, %v373_v32  ;;  %p725_p12 = scmp.ne.s32.totalorder %s1060_s30, %s724_s13  ;;  %s728_s24 = sshll.u32 %s823_s18, 4  ;;  %s729_s24 = int_to_ptr.vmem [resolvable:$false] %s728_s24 }
 0x1ca   : > { %s730_s23 = scalar_lea.vmem %s729_s24, 32  ;;  %p731_p5 = scmp.lt.s32.totalorder %s1060_s30, %s729_s24 }
 0x1cb   : > { %v376_v35 = vrot.slane %v375_v34, 1  ;;  %p726_p11 = pnand %p725_p12, %p945_p10  ;;  %p732_p9 = scmp.lt.s32.totalorder %s730_s23, %s724_s13 }
 0x1cd   : > { %v377_v37 = vadd.f32 %v376_v35, %v375_v34  ;;  %p727_p0 = pneg %p726_p11  ;;  %p733_p1 = por %p732_p9, %p731_p5 }
 0x1cf   : > { %v378_v38 = vadd.f32 %v377_v37, %v370_v36  ;;  %p734_p2 = pnand %p733_p1, %p727_p0 }
 0x1d1   : > { %380 = vst.msk [vmem:[%s1013_s27] sm:$0x1] %vm259_vm0, %v378_v38 }
 0x1d2   : > { %737 = shalt.err (!%p734_p2)
}
 0x1d3   : > { %s738_s6 = scalar_lea.hbm %s1058_s7, 16  ;;  %s742_s14 = scalar_lea.hbm %s1113_s4, 32 }
 0x1d4   : > { %p739_p7 = scmp.ne.s32.totalorder %s1058_s7, %s738_s6  ;;  %p743_p4 = scmp.lt.u32.totalorder %s1058_s7, %s1113_s4 }
 0x1d5   : > { %p744_p6 = scmp.lt.u32.totalorder %s742_s14, %s738_s6  ;;  %p746_p12 = scmp.lt.u32.totalorder %s738_s6, %s1058_s7 }
 0x1d6   : > { %p740_p3 = pnand %p739_p7, %p945_p10 }
 0x1d7   : > { %p745_p8 = por %p744_p6, %p743_p4 }
 0x1d8   : > { %p741_p13 = pneg %p740_p3 }
 0x1d9   : > { %p747_p11 = por %p746_p12, %p745_p8 }
 0x1db   : > { %p748_p0 = pnand %p747_p11, %p741_p13 }
 0x1dd   : > { %751 = shalt.err (!%p748_p0)
}
 0x1de   : > { %563 = dma.vmem_to_hbm [thread:$0]  (%p945_p10), %s1060_s30, 16, %s1058_s7, %s387_s28  }
 0x1df PF: > { %s425_s12 = sand.u32 1, %s794_s15   ;;  %p1131_p5 = scmp.ne.s32.totalorder %s1121_s26, 0 }
 0x1e0   : > { %p1132_p9 = scmp.ge.s32.totalorder %s814_s20, 2  ;;  %s426_s29 = scalar_lea.sflag [#allocation4], %s425_s12 }
 0x1e2   : > { %p575_p1 = pnand %p1132_p9, %p1131_p5 }
 0x1e4   : > { %785 = dma.done.wait (!%p575_p1), %s426_s29, 128  }
 0x1e5   : > { %787 = vsyncadd (!%p575_p1), %s426_s29, 4294967168  ;;  %s435_s9 = scalar_lea.sflag [#allocation9], %s425_s12 }
 0x1e6   : > { %789 = dma.done.wait (!%p575_p1), %s435_s9, 16  }
 0x1e7   : > { %791 = vsyncadd (!%p575_p1), %s435_s9, 4294967280  ;;  %s25_s20 = sadd.s32 1, %s814_s20   ;;  %s1133_s15 = smov %s798_s16 }
 0x1e8   : > { %p22_p2 = scmp.ge.s32.totalorder %s25_s20, 4   ;;  %s1134_s16 = smov %s802_s17 }
 0x1e9   : > { %s1135_s17 = smov %s954_s10  ;;  %s1136_s18 = smov %s810_s19 }
 0x1ea   : > { %s1137_s19 = smov %s1139_s5  ;;  %24 = sbr.rel (!%p22_p2) target bundleno = 9 (0x9), region = 102 }
 0x1f1   :  { %439 = vsyncpa [#allocation3], 1 }
 0x1f2   :  { %441 = vsyncpa [#allocation3 + $0x1], 1 }
 0x1f3   :  { %442 = vsyncpa [#allocation6], 1 }
 0x1f4   :  { %443 = vsyncpa [#allocation4], 1 }
 0x1f5   :  { %445 = vsyncpa [#allocation4 + $0x1], 1 }
 0x1f6   :  { %446 = vsyncpa [#allocation9], 1 }
 0x1f7   :  { %448 = vsyncpa [#allocation9 + $0x1], 1 }

</bundles_post_ra>
